<compile_context>
chip_gen: v6e
topology: v6e:2x2x1
jax: 0.10.0
libtpu: 0.0.40
codegen_flags: <defaults>
</compile_context>

<pallas_src>
import functools

import numpy as np
import jax
import jax.numpy as jnp
from jax import lax
from jax.experimental import pallas as pl
from jax.experimental.pallas import tpu as pltpu


# --------------------------------------------------------------------------------------
# Align-corners bilinear interpolation expressed as dense matrices (2 nonzeros / row),
# so the resize becomes two MXU matmuls instead of gathers.
# --------------------------------------------------------------------------------------
def _bilinear_matrix_np(n_out, n_in):
    M = np.zeros((n_out, n_in), np.float32)
    if n_out == 1 or n_in == 1:
        M[:, 0] = 1.0
        return M
    scale = (n_in - 1) / (n_out - 1)
    for o in range(n_out):
        s = o * scale
        i0 = min(int(np.floor(s)), n_in - 1)
        i1 = min(i0 + 1, n_in - 1)
        w = s - i0
        M[o, i0] += 1.0 - w
        M[o, i1] += w
    return M


# --------------------------------------------------------------------------------------
# Pallas kernel 1: fused x-upsample + dual pixel cross-entropy (main + aux), mean over
# valid pixels. Grid = (B, output-row tiles). Scalar accumulation in SMEM outputs.
# --------------------------------------------------------------------------------------
def _dual_ce_fused_kernel(main_ref, aux_ref, wx_ref, tgt_ref,
                          sum_m_ref, sum_a_ref, cnt_ref,
                          *, n_classes, ignore_index):
    first = jnp.logical_and(pl.program_id(0) == 0, pl.program_id(1) == 0)

    @pl.when(first)
    def _():
        sum_m_ref[0] = 0.0
        sum_a_ref[0] = 0.0
        cnt_ref[0] = 0.0

    wx = wx_ref[...]                       # (Ws, Wp)  x-interp matrix (resident in VMEM)
    tgt = tgt_ref[0]                       # (TH, Wp)  int32 labels for this row tile
    valid = tgt != ignore_index            # (TH, Wp)  bool

    def ce_sum(logits_ref):
        # Per-class lane expansion Ws -> Wp on the MXU; CE math in 2-D (TH, Wp) slabs.
        slabs = [jnp.dot(logits_ref[0, c], wx, preferred_element_type=jnp.float32)
                 for c in range(n_classes)]
        m = slabs[0]
        for s in slabs[1:]:
            m = jnp.maximum(m, s)
        den = jnp.zeros_like(m)
        tgt_logit = jnp.zeros_like(m)
        for c, s in enumerate(slabs):
            den = den + jnp.exp(s - m)
            tgt_logit = tgt_logit + jnp.where(tgt == c, s, 0.0)
        lse = m + jnp.log(den)
        return jnp.sum(jnp.where(valid, lse - tgt_logit, 0.0))

    sum_m_ref[0] += ce_sum(main_ref)
    sum_a_ref[0] += ce_sum(aux_ref)
    cnt_ref[0] += jnp.sum(jnp.where(valid, 1.0, 0.0))


def aux_main_ce_loss_pallas(seg, seg_aux, target, ignore_index, seg_weight, aux_weight,
                            tile_rows=32):
    """seg/seg_aux: (B, C, Hs, Ws) low-res logits; target: (B, H, W) int labels.

    Returns seg_weight * meanCE(bilinear_up(seg), target)
          + aux_weight * meanCE(bilinear_up(seg_aux), target),
    with align_corners=True bilinear upsampling fused into the CE kernel along W.
    """
    B, C, Hs, Ws = seg.shape
    _, H, W = target.shape
    TH = int(tile_rows)                                   # output rows per grid step (mult. of 8)
    Hp = ((H + TH - 1) // TH) * TH
    Wp = ((W + 127) // 128) * 128                         # lane-dense output width

    # Separable align-corners bilinear:  up(seg) = Wy @ seg @ Wx  (per batch & class).
    wy = np.zeros((Hp, Hs), np.float32)
    wy[:H] = _bilinear_matrix_np(H, Hs)                   # padded rows are zero -> masked by target
    wx = np.zeros((Ws, Wp), np.float32)
    wx[:, :W] = _bilinear_matrix_np(W, Ws).T              # padded cols are zero -> ignore_index
    wy = jnp.asarray(wy)
    wx = jnp.asarray(wx)

    # y-interpolation in XLA (cheap MXU einsum on the low-res W axis). The much larger
    # x-interpolation (lane expansion) is fused into the Pallas CE kernel, so the
    # full-resolution logits are never materialized in HBM.
    ly_main = jnp.einsum('yh,bchw->bcyw', wy, seg.astype(jnp.float32))     # (B, C, Hp, Ws)
    ly_aux = jnp.einsum('yh,bchw->bcyw', wy, seg_aux.astype(jnp.float32))  # (B, C, Hp, Ws)

    tgt = target.astype(jnp.int32)
    if Hp != H or Wp != W:
        tgt = jnp.pad(tgt, ((0, 0), (0, Hp - H), (0, Wp - W)),
                      constant_values=int(ignore_index))

    kernel = functools.partial(_dual_ce_fused_kernel,
                               n_classes=int(C), ignore_index=int(ignore_index))
    out_shape = (jax.ShapeDtypeStruct((1,), jnp.float32),
                 jax.ShapeDtypeStruct((1,), jnp.float32),
                 jax.ShapeDtypeStruct((1,), jnp.float32))
    sum_m, sum_a, cnt = pl.pallas_call(
        kernel,
        out_shape=out_shape,
        grid_spec=pltpu.PrefetchScalarGridSpec(
            num_scalar_prefetch=0,
            grid=(B, Hp // TH),
            in_specs=[pl.BlockSpec((1, C, TH, Ws), lambda b, i: (b, 0, i, 0)),
                      pl.BlockSpec((1, C, TH, Ws), lambda b, i: (b, 0, i, 0)),
                      pl.BlockSpec((Ws, Wp), lambda b, i: (0, 0)),       # resident
                      pl.BlockSpec((1, TH, Wp), lambda b, i: (b, i, 0))],
            out_specs=(pl.BlockSpec(memory_space=pltpu.MemorySpace.SMEM),
                       pl.BlockSpec(memory_space=pltpu.MemorySpace.SMEM),
                       pl.BlockSpec(memory_space=pltpu.MemorySpace.SMEM))),
        compiler_params=pltpu.CompilerParams(
            dimension_semantics=("arbitrary", "arbitrary")),
    )(ly_main, ly_aux, wx, tgt)

    denom = jnp.maximum(cnt[0], 1.0)
    return seg_weight * sum_m[0] / denom + aux_weight * sum_a[0] / denom


# --------------------------------------------------------------------------------------
# Pallas kernel 2: supervised pixel contrastive loss (_contrastive() math), row-tiled.
# --------------------------------------------------------------------------------------
def _contrastive_kernel(f_row_ref, f_all_ref, lr_ref, lc_ref, o_ref,
                        *, temperature, base_temperature, t_true, tr):
    step = pl.program_id(0)

    @pl.when(step == 0)
    def _():
        o_ref[0] = 0.0

    fq = f_row_ref[...]            # (TR, Dp)  row block of anchor features
    fa = f_all_ref[...]            # (Tp, Dp)  all contrast features (resident)

    # anchor_dot_contrast block = fq @ fa.T / temperature   (f32 MXU; the (TR, Tp)
    # masked reductions dominate, not the matmul)
    s = lax.dot_general(fq, fa, (((1,), (1,)), ((), ())),
                        preferred_element_type=jnp.float32) * (1.0 / temperature)  # (TR, Tp)

    cid = lax.broadcasted_iota(jnp.int32, s.shape, 1)                 # global column index
    rid = lax.broadcasted_iota(jnp.int32, s.shape, 0) + step * tr     # global row index
    col_valid = cid < t_true

    row_max = jnp.max(jnp.where(col_valid, s, -3.0e38), axis=1, keepdims=True)
    logits = s - row_max
    exp_logits = jnp.exp(logits)
    ev = jnp.where(col_valid, exp_logits, 0.0)

    pos = jnp.logical_and(lr_ref[...] == lc_ref[...], col_valid)      # same-class (incl. diagonal)
    sum_all = jnp.sum(ev, axis=1, keepdims=True)
    sum_pos = jnp.sum(jnp.where(pos, ev, 0.0), axis=1, keepdims=True)
    neg_logits = sum_all - sum_pos                                     # = sum(exp * (1 - pos))

    # Reference denominator: exp_logits + neg_logits (NOT logsumexp); guarded vs underflow.
    log_prob = logits - jnp.log(jnp.maximum(exp_logits + neg_logits, 1e-30))

    mask = jnp.logical_and(pos, rid != cid)                            # positives excl. self
    mlp_sum = jnp.sum(jnp.where(mask, log_prob, 0.0), axis=1, keepdims=True)
    mask_cnt = jnp.sum(jnp.where(mask, 1.0, 0.0), axis=1, keepdims=True)
    mean_log_prob_pos = mlp_sum / jnp.maximum(mask_cnt, 1.0)           # guard zero-positive rows
    loss_row = -(temperature / base_temperature) * mean_log_prob_pos   # (TR, 1)

    row_valid = (lax.broadcasted_iota(jnp.int32, loss_row.shape, 0) + step * tr) < t_true
    o_ref[0] += jnp.sum(jnp.where(row_valid, loss_row, 0.0))

    @pl.when(step == pl.num_programs(0) - 1)
    def _():
        o_ref[0] = o_ref[0] * (1.0 / t_true)


def contrastive_loss_pallas(feats_, labels_, temperature, base_temperature):
    """feats_: (A, V, D) float; labels_: (A,) float. Reproduces torch _contrastive()."""
    A, V, D = feats_.shape
    T = A * V
    # torch.cat(torch.unbind(feats_, dim=1), dim=0): row r corresponds to anchor r % A
    contrast = jnp.transpose(feats_, (1, 0, 2)).reshape(T, D).astype(jnp.float32)
    lab_full = jnp.tile(labels_.astype(jnp.float32), V)                # (T,)

    TR = 128
    Tp = max(TR, ((T + TR - 1) // TR) * TR)
    Dp = ((D + 127) // 128) * 128                                      # zero-pad D: no-op for F@F^T
    SENT = -12345.0                                                    # never equals a real class id

    F = jnp.zeros((Tp, Dp), jnp.float32).at[:T, :D].set(contrast)
    labp = jnp.full((Tp,), SENT, jnp.float32).at[:T].set(lab_full)
    lab_row = labp.reshape(Tp, 1)
    lab_col = labp.reshape(1, Tp)

    kernel = functools.partial(_contrastive_kernel,
                               temperature=float(temperature),
                               base_temperature=float(base_temperature),
                               t_true=int(T), tr=TR)
    out = pl.pallas_call(
        kernel,
        out_shape=jax.ShapeDtypeStruct((1,), jnp.float32),
        grid_spec=pltpu.PrefetchScalarGridSpec(
            num_scalar_prefetch=0,
            grid=(Tp // TR,),
            in_specs=[pl.BlockSpec((TR, Dp), lambda i: (i, 0)),     # row block of F
                      pl.BlockSpec((Tp, Dp), lambda i: (0, 0)),     # full F, resident
                      pl.BlockSpec((TR, 1), lambda i: (i, 0)),      # row labels
                      pl.BlockSpec((1, Tp), lambda i: (0, 0))],     # column labels, resident
            out_specs=pl.BlockSpec(memory_space=pltpu.MemorySpace.SMEM)),
        compiler_params=pltpu.CompilerParams(
            dimension_semantics=("arbitrary",)),
    )(F, F, lab_row, lab_col)
    return out[0]


# --------------------------------------------------------------------------------------
# Plain-JAX glue: nearest resize matching PyTorch semantics (label downsampling only)
# --------------------------------------------------------------------------------------
def nearest_resize(x, out_h, out_w):
    """x: (B, C, H, W); F.interpolate(mode='nearest')."""
    B, C, H, W = x.shape
    yi = jnp.clip(jnp.floor(jnp.arange(out_h) * (H / out_h)).astype(jnp.int32), 0, H - 1)
    xi = jnp.clip(jnp.floor(jnp.arange(out_w) * (W / out_w)).astype(jnp.int32), 0, W - 1)
    return x[:, :, yi, :][:, :, :, xi]


# --------------------------------------------------------------------------------------
# Host-side (data-dependent) hard anchor sampling, deterministic RNG.
# TODO(synk): dynamic-shape unique/nonzero/randperm sampling has no clean Pallas equivalent;
#             it is index selection (glue) done in numpy. The resulting T also varies with the
#             data, so the contrastive kernel retraces when (total_classes, n_view) changes.
# --------------------------------------------------------------------------------------
def hard_anchor_sampling(y_hat, y, max_samples, max_views, ignore_label, seed=0):
    rng = np.random.default_rng(seed)
    B, HW = y_hat.shape
    per_img_classes, total = [], 0
    for ii in range(B):
        cls = [int(c) for c in np.unique(y_hat[ii])
               if int(c) != ignore_label and int((y_hat[ii] == c).sum()) > max_views]
        per_img_classes.append(cls)
        total += len(cls)
    if total == 0:
        return None
    n_view = min(max_samples // total, max_views)

    flat_idx, cls_ids = [], []
    for ii in range(B):
        for c in per_img_classes[ii]:
            hard = np.nonzero((y_hat[ii] == c) & (y[ii] != c))[0]
            easy = np.nonzero((y_hat[ii] == c) & (y[ii] == c))[0]
            nh, ne = len(hard), len(easy)
            if nh >= n_view / 2 and ne >= n_view / 2:
                nhk = n_view // 2
                nek = n_view - nhk
            elif nh >= n_view / 2:
                nek = ne
                nhk = n_view - nek
            elif ne >= n_view / 2:
                nhk = nh
                nek = n_view - nhk
            else:
                raise Exception("this should never be touched")
            hard = hard[rng.permutation(nh)[:nhk]]
            easy = easy[rng.permutation(ne)[:nek]]
            idx = np.concatenate([hard, easy]).astype(np.int64)
            flat_idx.append(ii * HW + idx)              # flat into (B*HW)
            cls_ids.append(float(c))
    return (np.stack(flat_idx, axis=0).astype(np.int32),
            np.asarray(cls_ids, dtype=np.float32), n_view)


# --------------------------------------------------------------------------------------
# Module (forward-pass semantics of ContrastAuxCELoss; use_rmi=False -> FSAuxCELoss = aux+main CE)
# --------------------------------------------------------------------------------------
class Configer:
    def __init__(self, cfg):
        self.cfg = cfg

    def get(self, *keys):
        v = self.cfg
        for k in keys:
            v = v[k]
        return v

    def exists(self, *keys):
        v = self.cfg
        for k in keys:
            if not isinstance(v, dict) or k not in v:
                return False
            v = v[k]
        return True


class ContrastAuxCELossJAX:
    def __init__(self, configer):
        self.configer = configer
        self.ignore_index = -1
        if configer.exists('loss', 'params') and 'ce_ignore_index' in configer.get('loss', 'params'):
            self.ignore_index = configer.get('loss', 'params')['ce_ignore_index']
        self.loss_weight = configer.get('contrast', 'loss_weight')
        self.temperature = configer.get('contrast', 'temperature')
        self.base_temperature = configer.get('contrast', 'base_temperature')
        self.max_samples = configer.get('contrast', 'max_samples')
        self.max_views = configer.get('contrast', 'max_views')
        # FSAuxCELoss weighting (use_rmi=False path); openseg defaults if not configured.
        if configer.exists('network', 'loss_weights'):
            lw = configer.get('network', 'loss_weights')
            self.aux_weight = float(lw.get('aux_loss', 0.4))
            self.seg_weight = float(lw.get('seg_loss', 1.0))
        else:
            self.aux_weight, self.seg_weight = 0.4, 1.0
        # TODO(synk): use_rmi=True path (FSAuxRMILoss) not implemented; use_rmi=False -> aux+main CE.

    def _pixel_contrast_loss(self, feats, labels, predict):
        B, D, He, We = feats.shape
        lab = nearest_resize(labels[:, None].astype(jnp.float32), He, We)[:, 0].astype(jnp.int32)
        lab = lab.reshape(B, -1)
        pred = predict.reshape(B, -1)
        feats_flat = jnp.transpose(feats, (0, 2, 3, 1)).reshape(B * He * We, D)

        # TODO(synk): host round-trip serializes the device; unavoidable with the
        #             data-dependent (dynamic-shape) anchor sampling of the reference.
        y_hat_np = np.asarray(jax.device_get(lab))
        y_np = np.asarray(jax.device_get(pred))
        sel = hard_anchor_sampling(y_hat_np, y_np, self.max_samples,
                                   self.max_views, self.ignore_index)
        if sel is None:
            return jnp.float32(0.0)
        flat_idx, cls_ids, n_view = sel
        feats_ = jnp.take(feats_flat, jnp.asarray(flat_idx), axis=0)   # (A, n_view, D) one gather
        labels_ = jnp.asarray(cls_ids)
        return contrastive_loss_pallas(feats_, labels_, self.temperature, self.base_temperature)

    def __call__(self, preds, target, with_embed=False):
        assert 'seg' in preds and 'seg_aux' in preds and 'embed' in preds
        seg = preds['seg']          # (B, C, Hs, Ws)
        seg_aux = preds['seg_aux']  # (B, C, Hs, Ws)
        embed = preds['embed']      # (B, D, He, We)

        # Fused upsample + main/aux CE in a single Pallas pass over the target.
        loss_seg = aux_main_ce_loss_pallas(seg, seg_aux, target, self.ignore_index,
                                           self.seg_weight, self.aux_weight)

        predict = jnp.argmax(seg, axis=1).astype(jnp.int32)   # (B, Hs, Ws)
        loss_contrast = self._pixel_contrast_loss(embed, target, predict)

        if with_embed:
            return loss_seg + self.loss_weight * loss_contrast
        return loss_seg + 0.0 * loss_contrast


# --------------------------------------------------------------------------------------
if __name__ == "__main__":
    cfg = Configer({
        'contrast': {'temperature': 0.1, 'base_temperature': 0.07,
                     'max_samples': 1024, 'max_views': 16,
                     'loss_weight': 0.1, 'use_rmi': False},
        'loss': {'params': {'ce_ignore_index': -1}},
        'network': {'loss_weights': {'aux_loss': 0.4, 'seg_loss': 1.0}},
    })

    B, C, D = 2, 4, 32
    Hs = Ws = 16          # seg / embed spatial
    H = W = 32            # target spatial

    key = jax.random.PRNGKey(0)
    k1, k2, k3, k4 = jax.random.split(key, 4)

    target = jax.random.randint(k1, (B, H, W), 0, C).astype(jnp.int32)
    target = target.at[:, :2, :2].set(-1)   # a few ignored pixels

    # seg logits loosely correlated with the (downsampled) labels so that both
    # easy and hard anchors exist for the contrastive sampler.
    lab_ds = nearest_resize(target[:, None].astype(jnp.float32), Hs, Ws)[:, 0].astype(jnp.int32)
    onehot = jax.nn.one_hot(jnp.clip(lab_ds, 0, C - 1), C, axis=1).astype(jnp.float32)
    seg = jax.random.normal(k2, (B, C, Hs, Ws), jnp.float32) + 1.5 * onehot
    seg_aux = jax.random.normal(k4, (B, C, Hs, Ws), jnp.float32) + 1.0 * onehot

    # Embeddings are L2-normalized along the channel dim, matching the projection head that
    # feeds PixelContrastLoss (unnormalized features make the reference loss overflow too).
    embed = jax.random.normal(k3, (B, D, Hs, Ws), jnp.float32)
    embed = embed / (jnp.linalg.norm(embed, axis=1, keepdims=True) + 1e-12)

    module = ContrastAuxCELossJAX(cfg)
    loss = module({'seg': seg, 'seg_aux': seg_aux, 'embed': embed}, target, with_embed=True)
    loss = jax.block_until_ready(loss)
    assert bool(jnp.isfinite(loss)), "loss is not finite"
    print("KERNEL_OK")
</pallas_src>

<mosaic_0001>
module attributes {stable_mosaic.version = 11 : i64} {
  func.func @_dual_ce_fused_kernel(%arg0: i32, %arg1: i32, %arg2: memref<1x4x32x16xf32, #tpu.memory_space<vmem>>, %arg3: memref<1x4x32x16xf32, #tpu.memory_space<vmem>>, %arg4: memref<16x128xf32, #tpu.memory_space<vmem>>, %arg5: memref<1x32x128xi32, #tpu.memory_space<vmem>>, %arg6: memref<1xf32, #tpu.memory_space<smem>>, %arg7: memref<1xf32, #tpu.memory_space<smem>>, %arg8: memref<1xf32, #tpu.memory_space<smem>>) attributes {dimension_semantics = [#tpu.dimension_semantics<arbitrary>, #tpu.dimension_semantics<arbitrary>], iteration_bounds = array<i64: 2, 1>, scalar_prefetch = 0 : i64, scratch_operands = 0 : i64, tpu.core_type = #tpu.core_type<tc>, window_params = [{transform_indices = @transform_0, window_bounds = array<i64: 1, 4, 32, 16>}, {transform_indices = @transform_1, window_bounds = array<i64: 1, 4, 32, 16>}, {pipeline_mode = #tpu.pipeline_mode<synchronous>, transform_indices = @transform_2, window_bounds = array<i64: 16, 128>}, {transform_indices = @transform_3, window_bounds = array<i64: 1, 32, 128>}, {transform_indices = @transform_4, window_bounds = array<i64: 1>}, {transform_indices = @transform_5, window_bounds = array<i64: 1>}, {transform_indices = @transform_6, window_bounds = array<i64: 1>}]} {
    %c0_i32 = arith.constant 0 : i32
    %0 = arith.cmpi eq, %arg0, %c0_i32 : i32
    %c0_i32_0 = arith.constant 0 : i32
    %1 = arith.cmpi eq, %arg1, %c0_i32_0 : i32
    %2 = arith.andi %0, %1 : i1
    %3 = arith.extui %2 : i1 to i32
    %c0_i32_1 = arith.constant 0 : i32
    %4 = arith.cmpi ne, %3, %c0_i32_1 : i32
    scf.if %4 {
      %cst_72 = arith.constant 0.000000e+00 : f32
      %c0_73 = arith.constant 0 : index
      %142 = memref.load %arg6[%c0_73] : memref<1xf32, #tpu.memory_space<smem>>
      memref.store %cst_72, %arg6[%c0_73] : memref<1xf32, #tpu.memory_space<smem>>
      %cst_74 = arith.constant 0.000000e+00 : f32
      %c0_75 = arith.constant 0 : index
      %143 = memref.load %arg7[%c0_75] : memref<1xf32, #tpu.memory_space<smem>>
      memref.store %cst_74, %arg7[%c0_75] : memref<1xf32, #tpu.memory_space<smem>>
      %cst_76 = arith.constant 0.000000e+00 : f32
      %c0_77 = arith.constant 0 : index
      %144 = memref.load %arg8[%c0_77] : memref<1xf32, #tpu.memory_space<smem>>
      memref.store %cst_76, %arg8[%c0_77] : memref<1xf32, #tpu.memory_space<smem>>
    } else {
    }
    %c0 = arith.constant 0 : index
    %c0_2 = arith.constant 0 : index
    %5 = vector.load %arg4[%c0, %c0_2] : memref<16x128xf32, #tpu.memory_space<vmem>>, vector<16x128xf32>
    %c0_3 = arith.constant 0 : index
    %c0_4 = arith.constant 0 : index
    %c0_5 = arith.constant 0 : index
    %6 = vector.load %arg5[%c0_3, %c0_4, %c0_5] : memref<1x32x128xi32, #tpu.memory_space<vmem>>, vector<1x32x128xi32>
    %7 = vector.shape_cast %6 : vector<1x32x128xi32> to vector<32x128xi32>
    %c-1_i32 = arith.constant -1 : i32
    %8 = vector.broadcast %c-1_i32 : i32 to vector<32x128xi32>
    %9 = arith.cmpi ne, %7, %8 : vector<32x128xi32>
    %c0_6 = arith.constant 0 : index
    %10 = memref.load %arg6[%c0_6] : memref<1xf32, #tpu.memory_space<smem>>
    %c0_7 = arith.constant 0 : index
    %c0_8 = arith.constant 0 : index
    %c0_9 = arith.constant 0 : index
    %c0_10 = arith.constant 0 : index
    %11 = vector.load %arg2[%c0_7, %c0_8, %c0_9, %c0_10] : memref<1x4x32x16xf32, #tpu.memory_space<vmem>>, vector<1x1x32x16xf32>
    %12 = vector.shape_cast %11 : vector<1x1x32x16xf32> to vector<32x16xf32>
    %cst = arith.constant dense<0.000000e+00> : vector<32x128xf32>
    %13 = tpu.matmul %12, %5, %cst {dimension_numbers = #tpu.dot_dimension_numbers<[1], [0], [0], [1], [0, 0, 1, 1], [], []>} : vector<32x16xf32>, vector<16x128xf32>, vector<32x128xf32> -> vector<32x128xf32>
    %c0_11 = arith.constant 0 : index
    %c1 = arith.constant 1 : index
    %c0_12 = arith.constant 0 : index
    %c0_13 = arith.constant 0 : index
    %14 = vector.load %arg2[%c0_11, %c1, %c0_12, %c0_13] : memref<1x4x32x16xf32, #tpu.memory_space<vmem>>, vector<1x1x32x16xf32>
    %15 = vector.shape_cast %14 : vector<1x1x32x16xf32> to vector<32x16xf32>
    %cst_14 = arith.constant dense<0.000000e+00> : vector<32x128xf32>
    %16 = tpu.matmul %15, %5, %cst_14 {dimension_numbers = #tpu.dot_dimension_numbers<[1], [0], [0], [1], [0, 0, 1, 1], [], []>} : vector<32x16xf32>, vector<16x128xf32>, vector<32x128xf32> -> vector<32x128xf32>
    %c0_15 = arith.constant 0 : index
    %c2 = arith.constant 2 : index
    %c0_16 = arith.constant 0 : index
    %c0_17 = arith.constant 0 : index
    %17 = vector.load %arg2[%c0_15, %c2, %c0_16, %c0_17] : memref<1x4x32x16xf32, #tpu.memory_space<vmem>>, vector<1x1x32x16xf32>
    %18 = vector.shape_cast %17 : vector<1x1x32x16xf32> to vector<32x16xf32>
    %cst_18 = arith.constant dense<0.000000e+00> : vector<32x128xf32>
    %19 = tpu.matmul %18, %5, %cst_18 {dimension_numbers = #tpu.dot_dimension_numbers<[1], [0], [0], [1], [0, 0, 1, 1], [], []>} : vector<32x16xf32>, vector<16x128xf32>, vector<32x128xf32> -> vector<32x128xf32>
    %c0_19 = arith.constant 0 : index
    %c3 = arith.constant 3 : index
    %c0_20 = arith.constant 0 : index
    %c0_21 = arith.constant 0 : index
    %20 = vector.load %arg2[%c0_19, %c3, %c0_20, %c0_21] : memref<1x4x32x16xf32, #tpu.memory_space<vmem>>, vector<1x1x32x16xf32>
    %21 = vector.shape_cast %20 : vector<1x1x32x16xf32> to vector<32x16xf32>
    %cst_22 = arith.constant dense<0.000000e+00> : vector<32x128xf32>
    %22 = tpu.matmul %21, %5, %cst_22 {dimension_numbers = #tpu.dot_dimension_numbers<[1], [0], [0], [1], [0, 0, 1, 1], [], []>} : vector<32x16xf32>, vector<16x128xf32>, vector<32x128xf32> -> vector<32x128xf32>
    %23 = arith.maximumf %13, %16 : vector<32x128xf32>
    %24 = arith.maximumf %23, %19 : vector<32x128xf32>
    %25 = arith.maximumf %24, %22 : vector<32x128xf32>
    %cst_23 = arith.constant 0.000000e+00 : f32
    %26 = vector.broadcast %cst_23 : f32 to vector<32x128xf32>
    %cst_24 = arith.constant 0.000000e+00 : f32
    %27 = vector.broadcast %cst_24 : f32 to vector<32x128xf32>
    %28 = arith.subf %13, %25 : vector<32x128xf32>
    %29 = math.exp %28 : vector<32x128xf32>
    %30 = arith.addf %26, %29 : vector<32x128xf32>
    %c0_i32_25 = arith.constant 0 : i32
    %31 = vector.broadcast %c0_i32_25 : i32 to vector<32x128xi32>
    %32 = arith.cmpi eq, %7, %31 : vector<32x128xi32>
    %cst_26 = arith.constant 0.000000e+00 : f32
    %33 = vector.broadcast %cst_26 : f32 to vector<32x128xf32>
    %34 = arith.select %32, %13, %33 : vector<32x128xi1>, vector<32x128xf32>
    %35 = arith.addf %27, %34 : vector<32x128xf32>
    %36 = arith.subf %16, %25 : vector<32x128xf32>
    %37 = math.exp %36 : vector<32x128xf32>
    %38 = arith.addf %30, %37 : vector<32x128xf32>
    %c1_i32 = arith.constant 1 : i32
    %39 = vector.broadcast %c1_i32 : i32 to vector<32x128xi32>
    %40 = arith.cmpi eq, %7, %39 : vector<32x128xi32>
    %cst_27 = arith.constant 0.000000e+00 : f32
    %41 = vector.broadcast %cst_27 : f32 to vector<32x128xf32>
    %42 = arith.select %40, %16, %41 : vector<32x128xi1>, vector<32x128xf32>
    %43 = arith.addf %35, %42 : vector<32x128xf32>
    %44 = arith.subf %19, %25 : vector<32x128xf32>
    %45 = math.exp %44 : vector<32x128xf32>
    %46 = arith.addf %38, %45 : vector<32x128xf32>
    %c2_i32 = arith.constant 2 : i32
    %47 = vector.broadcast %c2_i32 : i32 to vector<32x128xi32>
    %48 = arith.cmpi eq, %7, %47 : vector<32x128xi32>
    %cst_28 = arith.constant 0.000000e+00 : f32
    %49 = vector.broadcast %cst_28 : f32 to vector<32x128xf32>
    %50 = arith.select %48, %19, %49 : vector<32x128xi1>, vector<32x128xf32>
    %51 = arith.addf %43, %50 : vector<32x128xf32>
    %52 = arith.subf %22, %25 : vector<32x128xf32>
    %53 = math.exp %52 : vector<32x128xf32>
    %54 = arith.addf %46, %53 : vector<32x128xf32>
    %c3_i32 = arith.constant 3 : i32
    %55 = vector.broadcast %c3_i32 : i32 to vector<32x128xi32>
    %56 = arith.cmpi eq, %7, %55 : vector<32x128xi32>
    %cst_29 = arith.constant 0.000000e+00 : f32
    %57 = vector.broadcast %cst_29 : f32 to vector<32x128xf32>
    %58 = arith.select %56, %22, %57 : vector<32x128xi1>, vector<32x128xf32>
    %59 = arith.addf %51, %58 : vector<32x128xf32>
    %60 = math.log %54 : vector<32x128xf32>
    %61 = arith.addf %25, %60 : vector<32x128xf32>
    %62 = arith.subf %61, %59 : vector<32x128xf32>
    %cst_30 = arith.constant 0.000000e+00 : f32
    %63 = vector.broadcast %cst_30 : f32 to vector<32x128xf32>
    %64 = arith.select %9, %62, %63 : vector<32x128xi1>, vector<32x128xf32>
    %65 = vector.shape_cast %64 : vector<32x128xf32> to vector<1x32x128xf32>
    %cst_31 = arith.constant dense<0.000000e+00> : vector<1xf32>
    %66 = vector.multi_reduction <add>, %65, %cst_31 [1, 2] : vector<1x32x128xf32> to vector<1xf32>
    %67 = vector.shape_cast %66 : vector<1xf32> to vector<1x1x1xf32>
    %68 = vector.extract %67[0, 0, 0] : f32 from vector<1x1x1xf32>
    %69 = arith.addf %10, %68 : f32
    %c0_32 = arith.constant 0 : index
    %70 = memref.load %arg6[%c0_32] : memref<1xf32, #tpu.memory_space<smem>>
    memref.store %69, %arg6[%c0_32] : memref<1xf32, #tpu.memory_space<smem>>
    %c0_33 = arith.constant 0 : index
    %71 = memref.load %arg7[%c0_33] : memref<1xf32, #tpu.memory_space<smem>>
    %c0_34 = arith.constant 0 : index
    %c0_35 = arith.constant 0 : index
    %c0_36 = arith.constant 0 : index
    %c0_37 = arith.constant 0 : index
    %72 = vector.load %arg3[%c0_34, %c0_35, %c0_36, %c0_37] : memref<1x4x32x16xf32, #tpu.memory_space<vmem>>, vector<1x1x32x16xf32>
    %73 = vector.shape_cast %72 : vector<1x1x32x16xf32> to vector<32x16xf32>
    %cst_38 = arith.constant dense<0.000000e+00> : vector<32x128xf32>
    %74 = tpu.matmul %73, %5, %cst_38 {dimension_numbers = #tpu.dot_dimension_numbers<[1], [0], [0], [1], [0, 0, 1, 1], [], []>} : vector<32x16xf32>, vector<16x128xf32>, vector<32x128xf32> -> vector<32x128xf32>
    %c0_39 = arith.constant 0 : index
    %c1_40 = arith.constant 1 : index
    %c0_41 = arith.constant 0 : index
    %c0_42 = arith.constant 0 : index
    %75 = vector.load %arg3[%c0_39, %c1_40, %c0_41, %c0_42] : memref<1x4x32x16xf32, #tpu.memory_space<vmem>>, vector<1x1x32x16xf32>
    %76 = vector.shape_cast %75 : vector<1x1x32x16xf32> to vector<32x16xf32>
    %cst_43 = arith.constant dense<0.000000e+00> : vector<32x128xf32>
    %77 = tpu.matmul %76, %5, %cst_43 {dimension_numbers = #tpu.dot_dimension_numbers<[1], [0], [0], [1], [0, 0, 1, 1], [], []>} : vector<32x16xf32>, vector<16x128xf32>, vector<32x128xf32> -> vector<32x128xf32>
    %c0_44 = arith.constant 0 : index
    %c2_45 = arith.constant 2 : index
    %c0_46 = arith.constant 0 : index
    %c0_47 = arith.constant 0 : index
    %78 = vector.load %arg3[%c0_44, %c2_45, %c0_46, %c0_47] : memref<1x4x32x16xf32, #tpu.memory_space<vmem>>, vector<1x1x32x16xf32>
    %79 = vector.shape_cast %78 : vector<1x1x32x16xf32> to vector<32x16xf32>
    %cst_48 = arith.constant dense<0.000000e+00> : vector<32x128xf32>
    %80 = tpu.matmul %79, %5, %cst_48 {dimension_numbers = #tpu.dot_dimension_numbers<[1], [0], [0], [1], [0, 0, 1, 1], [], []>} : vector<32x16xf32>, vector<16x128xf32>, vector<32x128xf32> -> vector<32x128xf32>
    %c0_49 = arith.constant 0 : index
    %c3_50 = arith.constant 3 : index
    %c0_51 = arith.constant 0 : index
    %c0_52 = arith.constant 0 : index
    %81 = vector.load %arg3[%c0_49, %c3_50, %c0_51, %c0_52] : memref<1x4x32x16xf32, #tpu.memory_space<vmem>>, vector<1x1x32x16xf32>
    %82 = vector.shape_cast %81 : vector<1x1x32x16xf32> to vector<32x16xf32>
    %cst_53 = arith.constant dense<0.000000e+00> : vector<32x128xf32>
    %83 = tpu.matmul %82, %5, %cst_53 {dimension_numbers = #tpu.dot_dimension_numbers<[1], [0], [0], [1], [0, 0, 1, 1], [], []>} : vector<32x16xf32>, vector<16x128xf32>, vector<32x128xf32> -> vector<32x128xf32>
    %84 = arith.maximumf %74, %77 : vector<32x128xf32>
    %85 = arith.maximumf %84, %80 : vector<32x128xf32>
    %86 = arith.maximumf %85, %83 : vector<32x128xf32>
    %cst_54 = arith.constant 0.000000e+00 : f32
    %87 = vector.broadcast %cst_54 : f32 to vector<32x128xf32>
    %cst_55 = arith.constant 0.000000e+00 : f32
    %88 = vector.broadcast %cst_55 : f32 to vector<32x128xf32>
    %89 = arith.subf %74, %86 : vector<32x128xf32>
    %90 = math.exp %89 : vector<32x128xf32>
    %91 = arith.addf %87, %90 : vector<32x128xf32>
    %c0_i32_56 = arith.constant 0 : i32
    %92 = vector.broadcast %c0_i32_56 : i32 to vector<32x128xi32>
    %93 = arith.cmpi eq, %7, %92 : vector<32x128xi32>
    %cst_57 = arith.constant 0.000000e+00 : f32
    %94 = vector.broadcast %cst_57 : f32 to vector<32x128xf32>
    %95 = arith.select %93, %74, %94 : vector<32x128xi1>, vector<32x128xf32>
    %96 = arith.addf %88, %95 : vector<32x128xf32>
    %97 = arith.subf %77, %86 : vector<32x128xf32>
    %98 = math.exp %97 : vector<32x128xf32>
    %99 = arith.addf %91, %98 : vector<32x128xf32>
    %c1_i32_58 = arith.constant 1 : i32
    %100 = vector.broadcast %c1_i32_58 : i32 to vector<32x128xi32>
    %101 = arith.cmpi eq, %7, %100 : vector<32x128xi32>
    %cst_59 = arith.constant 0.000000e+00 : f32
    %102 = vector.broadcast %cst_59 : f32 to vector<32x128xf32>
    %103 = arith.select %101, %77, %102 : vector<32x128xi1>, vector<32x128xf32>
    %104 = arith.addf %96, %103 : vector<32x128xf32>
    %105 = arith.subf %80, %86 : vector<32x128xf32>
    %106 = math.exp %105 : vector<32x128xf32>
    %107 = arith.addf %99, %106 : vector<32x128xf32>
    %c2_i32_60 = arith.constant 2 : i32
    %108 = vector.broadcast %c2_i32_60 : i32 to vector<32x128xi32>
    %109 = arith.cmpi eq, %7, %108 : vector<32x128xi32>
    %cst_61 = arith.constant 0.000000e+00 : f32
    %110 = vector.broadcast %cst_61 : f32 to vector<32x128xf32>
    %111 = arith.select %109, %80, %110 : vector<32x128xi1>, vector<32x128xf32>
    %112 = arith.addf %104, %111 : vector<32x128xf32>
    %113 = arith.subf %83, %86 : vector<32x128xf32>
    %114 = math.exp %113 : vector<32x128xf32>
    %115 = arith.addf %107, %114 : vector<32x128xf32>
    %c3_i32_62 = arith.constant 3 : i32
    %116 = vector.broadcast %c3_i32_62 : i32 to vector<32x128xi32>
    %117 = arith.cmpi eq, %7, %116 : vector<32x128xi32>
    %cst_63 = arith.constant 0.000000e+00 : f32
    %118 = vector.broadcast %cst_63 : f32 to vector<32x128xf32>
    %119 = arith.select %117, %83, %118 : vector<32x128xi1>, vector<32x128xf32>
    %120 = arith.addf %112, %119 : vector<32x128xf32>
    %121 = math.log %115 : vector<32x128xf32>
    %122 = arith.addf %86, %121 : vector<32x128xf32>
    %123 = arith.subf %122, %120 : vector<32x128xf32>
    %cst_64 = arith.constant 0.000000e+00 : f32
    %124 = vector.broadcast %cst_64 : f32 to vector<32x128xf32>
    %125 = arith.select %9, %123, %124 : vector<32x128xi1>, vector<32x128xf32>
    %126 = vector.shape_cast %125 : vector<32x128xf32> to vector<1x32x128xf32>
    %cst_65 = arith.constant dense<0.000000e+00> : vector<1xf32>
    %127 = vector.multi_reduction <add>, %126, %cst_65 [1, 2] : vector<1x32x128xf32> to vector<1xf32>
    %128 = vector.shape_cast %127 : vector<1xf32> to vector<1x1x1xf32>
    %129 = vector.extract %128[0, 0, 0] : f32 from vector<1x1x1xf32>
    %130 = arith.addf %71, %129 : f32
    %c0_66 = arith.constant 0 : index
    %131 = memref.load %arg7[%c0_66] : memref<1xf32, #tpu.memory_space<smem>>
    memref.store %130, %arg7[%c0_66] : memref<1xf32, #tpu.memory_space<smem>>
    %c0_67 = arith.constant 0 : index
    %132 = memref.load %arg8[%c0_67] : memref<1xf32, #tpu.memory_space<smem>>
    %cst_68 = arith.constant 1.000000e+00 : f32
    %cst_69 = arith.constant 0.000000e+00 : f32
    %133 = vector.broadcast %cst_68 : f32 to vector<32x128xf32>
    %134 = vector.broadcast %cst_69 : f32 to vector<32x128xf32>
    %135 = arith.select %9, %133, %134 : vector<32x128xi1>, vector<32x128xf32>
    %136 = vector.shape_cast %135 : vector<32x128xf32> to vector<1x32x128xf32>
    %cst_70 = arith.constant dense<0.000000e+00> : vector<1xf32>
    %137 = vector.multi_reduction <add>, %136, %cst_70 [1, 2] : vector<1x32x128xf32> to vector<1xf32>
    %138 = vector.shape_cast %137 : vector<1xf32> to vector<1x1x1xf32>
    %139 = vector.extract %138[0, 0, 0] : f32 from vector<1x1x1xf32>
    %140 = arith.addf %132, %139 : f32
    %c0_71 = arith.constant 0 : index
    %141 = memref.load %arg8[%c0_71] : memref<1xf32, #tpu.memory_space<smem>>
    memref.store %140, %arg8[%c0_71] : memref<1xf32, #tpu.memory_space<smem>>
    return
  }
  func.func @transform_0(%arg0: i32, %arg1: i32) -> (i32, i32, i32, i32) {
    %c0_i32 = arith.constant 0 : i32
    %c0_i32_0 = arith.constant 0 : i32
    %c0_i32_1 = arith.constant 0 : i32
    return %arg0, %c0_i32, %arg1, %c0_i32_0 : i32, i32, i32, i32
  }
  func.func @transform_1(%arg0: i32, %arg1: i32) -> (i32, i32, i32, i32) {
    %c0_i32 = arith.constant 0 : i32
    %c0_i32_0 = arith.constant 0 : i32
    %c0_i32_1 = arith.constant 0 : i32
    return %arg0, %c0_i32, %arg1, %c0_i32_0 : i32, i32, i32, i32
  }
  func.func @transform_2(%arg0: i32, %arg1: i32) -> (i32, i32) {
    %c0_i32 = arith.constant 0 : i32
    %c0_i32_0 = arith.constant 0 : i32
    %c0_i32_1 = arith.constant 0 : i32
    return %c0_i32, %c0_i32_0 : i32, i32
  }
  func.func @transform_3(%arg0: i32, %arg1: i32) -> (i32, i32, i32) {
    %c0_i32 = arith.constant 0 : i32
    %c0_i32_0 = arith.constant 0 : i32
    return %arg0, %arg1, %c0_i32 : i32, i32, i32
  }
  func.func @transform_4(%arg0: i32, %arg1: i32) -> i32 {
    %c0_i32 = arith.constant 0 : i32
    %c0_i32_0 = arith.constant 0 : i32
    return %c0_i32 : i32
  }
  func.func @transform_5(%arg0: i32, %arg1: i32) -> i32 {
    %c0_i32 = arith.constant 0 : i32
    %c0_i32_0 = arith.constant 0 : i32
    return %c0_i32 : i32
  }
  func.func @transform_6(%arg0: i32, %arg1: i32) -> i32 {
    %c0_i32 = arith.constant 0 : i32
    %c0_i32_0 = arith.constant 0 : i32
    return %c0_i32 : i32
  }
}

</mosaic_0001>

<bundles_post_ra>
// kernel: tpu_custom_call.1
= control target key start
LH: loop header
LB: loop body
LE: loop exit
PB: predicated region body
PF: predicated region fallthrough
CT: control target
= control target key end

     0   :  { %12 = vsyncpa [#allocation3], 0  ;;  %s2596_s0 = inlined_call_operand.vmem [shape: f32[2,4,32,16], index: 0, kind: input, shape index: {}]   ;;  %s2597_s1 = inlined_call_operand.vmem [shape: f32[2,4,32,16], index: 1, kind: input, shape index: {}]   ;;  %s2598_s2 = inlined_call_operand.vmem [shape: f32[16,128], index: 2, kind: input, shape index: {}]   ;;  %s2599_s3 = inlined_call_operand.vmem [shape: s32[2,32,128], index: 3, kind: input, shape index: {}]   ;;  %s2600_s4 = inlined_call_operand.hbm [shape: f32[1], index: 4, kind: output, shape index: {0}]   ;;  %s2601_s5 = inlined_call_operand.hbm [shape: f32[1], index: 5, kind: output, shape index: {1}]   ;;  %s2602_s6 = inlined_call_operand.hbm [shape: f32[1], index: 6, kind: output, shape index: {2}]  }
   0x1   :  { %13 = vsyncpa [#allocation5], 0  ;;  %s2075_s21 = smov 0   ;;  %s2077_s22 = smov 0  }
   0x2   :  { %s2079_s23 = smov 0  }
   0x3 LB: > { %s1630_s24 = sadd.s32 4294967295, %s2033_s23   ;;  %s31_s25 = sadd.s32 1, %s2029_s22  ;;  %s2033_s23 = sphi %s2079_s23, %s19_s23   ;;  %s2029_s22 = sphi %s2077_s22, %s2632_s22   ;;  %s2025_s21 = sphi %s2075_s21, %s2631_s21  }
   0x4   : > { %p33_p0 = scmp.ge.s32.totalorder %s31_s25, 2  ;;  %p1633_p1 = scmp.ge.s32.totalorder %s2033_s23, 1 }
   0x5   : > { %p257_p2 = scmp.lt.s32.totalorder %s2033_s23, 3 }
   0x6   : > { %s2634_s25 = smov (%p33_p0, %s31_s25), 0 }
   0x7   : > { %p258_p3 = pnand %p1633_p1, %p257_p2 }
   0x9   : > { %261 = sbr.rel (%p258_p3) target bundleno = 523 (0x20b), region = 36 }
   0xe   : > { %v2099_v0 = vld [vmem:[%s2598_s2 + $0x8] sm:$0xff]  ;;  %v2104_v1 = vld [vmem:[%s2598_s2] sm:$0xff]  ;;  %p305_p4 = scmp.lt.s32.totalorder %s2025_s21, 1  ;;  %vm361_vm0 = vcmask 130048   ;;  %v2035_v38 = vmov 0.0   ;;  %p334_p5 = scmp.eq.s32.totalorder %s2025_s21, 0 }
   0xf   : > { %1757 = vmatprep.subr.mxu0 %v2099_v0  ;;  %1767 = vmatprep.subr.mxu1 %v2099_v0  ;;  %s2036_s18 = smov 0.0   ;;  %p2560_p6 = scmp.eq.s32.totalorder %s1630_s24, 1 }
  0x10   : > { %1758 = vmatpush3.msra.mxu0 %v2099_v0  ;;  %1768 = vmatpush3.msra.mxu1 %v2099_v0  ;;  %s2112_s30 = scalar_select %p305_p4, %s2025_s21, 1 }
  0x11   : > { %1759 = vmatprep.subr.mxu0 %v2104_v1  ;;  %1769 = vmatprep.subr.mxu1 %v2104_v1  ;;  %1843 = sst [smem:[#allocation2]] (%p334_p5), %s2036_s18  ;;  %s2037_s27 = smov [#allocation2]  }
  0x12   : > { %1760 = vmatpush3.msra.mxu0 %v2104_v1  ;;  %s1705_s7 = sshll.u32 %s2112_s30, 7  ;;  %1770 = vmatpush3.msra.mxu1 %v2104_v1  ;;  %s1707_s14 = sshll.u32 %s2112_s30, 5 }
  0x13   : > { %s2124_s10 = scalar_lea.vmem %s2596_s0, %s1705_s7  ;;  %1777 = vmatprep.subr.mxu0 %v2099_v0  ;;  %1787 = vmatprep.subr.mxu1 %v2099_v0  ;;  %s2165_s13 = scalar_lea.vmem %s2597_s1, %s1705_s7 }
  0x14   : > { %v357_v2 = vld [vmem:[%s2124_s10] sm:$0xff]  ;;  %v358_v4 = vld [vmem:[%s2124_s10 + $0x8] sm:$0xff]  ;;  %v359_v6 = vld [vmem:[%s2124_s10 + $0x10] sm:$0xff]  ;;  %s332_s17 = scalar_lea.vmem %s2599_s3, %s1707_s14  ;;  %1844 = sst [smem:[#allocation4]] (%p334_p5), %s2036_s18 }
  0x15   : > { %v1645_v3 = vld [vmem:[%s2124_s10 + $0x20] sm:$0xff]  ;;  %1761 = vmatprep.mubr.msk.f32.mxu0 %vm361_vm0, %v357_v2  ;;  %v1646_v5 = vld [vmem:[%s2124_s10 + $0x28] sm:$0xff]  ;;  %v1647_v7 = vld [vmem:[%s2124_s10 + $0x30] sm:$0xff]  ;;  %1845 = sst [smem:[#allocation6]] (%p334_p5), %s2036_s18  ;;  %s2038_s11 = smov [#allocation4]  }
  0x16   : > { %1771 = vmatprep.mubr.msk.f32.mxu1 %vm361_vm0, %v1645_v3  ;;  %1762 = vmatmul.mubr.msk.f32.vlgmr.msra.gmra.mxu0 %vm361_vm0, %v358_v4  ;;  %v360_v8 = vld [vmem:[%s2124_s10 + $0x18] sm:$0xff]  ;;  %v1653_v10 = vld [vmem:[%s2124_s10 + $0x40] sm:$0xff]  ;;  %v1654_v12 = vld [vmem:[%s2124_s10 + $0x48] sm:$0xff]  ;;  %s356_s19 = sld [smem:[#allocation2]]  ;;  %s2039_s14 = smov [#allocation6]  }
  0x17   : > { %1772 = vmatmul.mubr.msk.f32.vlgmr.msra.gmra.mxu1 %vm361_vm0, %v1646_v5  ;;  %1778 = vmatpush3.msra.mxu0 %v2099_v0  ;;  %v1648_v9 = vld [vmem:[%s2124_s10 + $0x38] sm:$0xff]  ;;  %v1661_v11 = vld [vmem:[%s2124_s10 + $0x60] sm:$0xff]  ;;  %v1662_v13 = vld [vmem:[%s2124_s10 + $0x68] sm:$0xff]  ;;  %s924_s30 = sld [smem:[#allocation4]] }
  0x18   : > { %1788 = vmatpush3.msra.mxu1 %v2099_v0  ;;  %1764 = vmatprep.mubr.msk.f32.mxu0 %vm361_vm0, %v359_v6  ;;  %v1655_v14 = vld [vmem:[%s2124_s10 + $0x50] sm:$0xff]  ;;  %v1656_v16 = vld [vmem:[%s2124_s10 + $0x58] sm:$0xff]  ;;  %v925_v18 = vld [vmem:[%s2165_s13] sm:$0xff]  ;;  %s1475_s7 = sld [smem:[#allocation6]] }
  0x19   : > { %1774 = vmatprep.mubr.msk.f32.mxu1 %vm361_vm0, %v1647_v7  ;;  %1779 = vmatprep.subr.mxu0 %v2104_v1  ;;  %v1663_v15 = vld [vmem:[%s2124_s10 + $0x70] sm:$0xff]  ;;  %v1664_v17 = vld [vmem:[%s2124_s10 + $0x78] sm:$0xff]  ;;  %v1673_v19 = vld [vmem:[%s2165_s13 + $0x20] sm:$0xff] }
  0x1a   : > { %1789 = vmatprep.subr.mxu1 %v2104_v1  ;;  %1765 = vmatmul.mubr.msk.f32.gmra.mxu0 %vm361_vm0, %v360_v8  ;;  %v926_v20 = vld [vmem:[%s2165_s13 + $0x8] sm:$0xff]  ;;  %v927_v22 = vld [vmem:[%s2165_s13 + $0x10] sm:$0xff]  ;;  %v928_v24 = vld [vmem:[%s2165_s13 + $0x18] sm:$0xff] }
  0x1b   : > { %1775 = vmatmul.mubr.msk.f32.gmra.mxu1 %vm361_vm0, %v1648_v9  ;;  %1780 = vmatpush3.msra.mxu0 %v2104_v1  ;;  %v1674_v21 = vld [vmem:[%s2165_s13 + $0x28] sm:$0xff]  ;;  %v1675_v23 = vld [vmem:[%s2165_s13 + $0x30] sm:$0xff]  ;;  %v1676_v25 = vld [vmem:[%s2165_s13 + $0x38] sm:$0xff] }
  0x1c   : > { %1790 = vmatpush3.msra.mxu1 %v2104_v1  ;;  %1781 = vmatprep.mubr.msk.f32.mxu0 %vm361_vm0, %v1653_v10  ;;  %v1681_v26 = vld [vmem:[%s2165_s13 + $0x40] sm:$0xff]  ;;  %v1682_v28 = vld [vmem:[%s2165_s13 + $0x48] sm:$0xff]  ;;  %v1683_v30 = vld [vmem:[%s2165_s13 + $0x50] sm:$0xff] }
  0x1d   : > { %1791 = vmatprep.mubr.msk.f32.mxu1 %vm361_vm0, %v1661_v11  ;;  %1797 = vmatprep.subr.mxu0 %v2099_v0  ;;  %v1689_v27 = vld [vmem:[%s2165_s13 + $0x60] sm:$0xff]  ;;  %v1690_v29 = vld [vmem:[%s2165_s13 + $0x68] sm:$0xff]  ;;  %v1691_v31 = vld [vmem:[%s2165_s13 + $0x70] sm:$0xff] }
  0x1e   : > { %1807 = vmatprep.subr.mxu1 %v2099_v0  ;;  %1782 = vmatmul.mubr.msk.f32.vlgmr.msra.gmra.mxu0 %vm361_vm0, %v1654_v12  ;;  %v1684_v32 = vld [vmem:[%s2165_s13 + $0x58] sm:$0xff]  ;;  %v2225_v34 = vld [vmem:[%s332_s17 + $0x8] sm:$0xff]  ;;  %v2227_v35 = vld [vmem:[%s332_s17] sm:$0xff] }
  0x1f   : > { %1792 = vmatmul.mubr.msk.f32.vlgmr.msra.gmra.mxu1 %vm361_vm0, %v1662_v13  ;;  %1798 = vmatpush3.msra.mxu0 %v2099_v0  ;;  %v1692_v33 = vld [vmem:[%s2165_s13 + $0x78] sm:$0xff]  ;;  %v2229_v36 = vld [vmem:[%s332_s17 + $0x10] sm:$0xff]  ;;  %vm352_vm1 = vcmp.ne.s32.totalorder %v2227_v35, 4294967295  ;;  %vm353_vm2 = vcmp.ne.s32.totalorder %v2225_v34, 4294967295  ;;  %vm794_vm5 = vcmp.eq.s32.totalorder %v2225_v34, 0  ;;  %vm793_vm6 = vcmp.eq.s32.totalorder %v2227_v35, 0 }
  0x20   : > { %1808 = vmatpush3.msra.mxu1 %v2099_v0  ;;  %1784 = vmatprep.mubr.msk.f32.mxu0 %vm361_vm0, %v1655_v14  ;;  %vm354_vm3 = vcmp.ne.s32.totalorder %v2229_v36, 4294967295  ;;  %v2234_v37 = vld [vmem:[%s332_s17 + $0x18] sm:$0xff]  ;;  %v1476_v39 = vsel %vm352_vm1, 1.0, %v2035_v38  ;;  %v1477_v40 = vsel %vm353_vm2, 1.0, %v2035_v38  ;;  %vm821_vm7 = vcmp.eq.s32.totalorder %v2227_v35, 1 }
  0x21   : > { %1794 = vmatprep.mubr.msk.f32.mxu1 %vm361_vm0, %v1663_v15  ;;  %1799 = vmatprep.subr.mxu0 %v2104_v1  ;;  %v1478_v41 = vsel %vm354_vm3, 1.0, %v2035_v38  ;;  %vm2609_vm4 = vcmp.ne.s32.totalorder %v2234_v37, 4294967295  ;;  %v1480_v42 = vadd.f32 %v1477_v40, %v1476_v39  ;;  %vm822_vm8 = vcmp.eq.s32.totalorder %v2225_v34, 1 }
  0x22   : > { %1809 = vmatprep.subr.mxu1 %v2104_v1  ;;  %1785 = vmatmul.mubr.msk.f32.gmra.mxu0 %vm361_vm0, %v1656_v16  ;;  %v1479_v43 = vsel %vm2609_vm4, 1.0, %v2035_v38  ;;  %vm796_vm9 = vcmp.eq.s32.totalorder %v2234_v37, 0  ;;  %vm824_vm10 = vcmp.eq.s32.totalorder %v2234_v37, 1  ;;  %vm2610_vm11 = vcmp.eq.s32.totalorder %v2229_v36, 0 }
  0x23   : > { %1795 = vmatmul.mubr.msk.f32.gmra.mxu1 %vm361_vm0, %v1664_v17  ;;  %1800 = vmatpush3.msra.mxu0 %v2104_v1  ;;  %v1481_v44 = vadd.f32 %v1480_v42, %v1478_v41  ;;  %vm849_vm12 = vcmp.eq.s32.totalorder %v2227_v35, 2  ;;  %vm2612_vm13 = vcmp.eq.s32.totalorder %v2229_v36, 1  ;;  %vm850_vm14 = vcmp.eq.s32.totalorder %v2225_v34, 2 }
  0x24   : > { %1810 = vmatpush3.msra.mxu1 %v2104_v1  ;;  %1801 = vmatprep.mubr.msk.f32.mxu0 %vm361_vm0, %v925_v18  ;;  %vm2611_vm15 = vcmp.eq.s32.totalorder %v2225_v34, 3  ;;  %vm851_vm4 = vcmp.eq.s32.totalorder %v2229_v36, 2 }
  0x25   : > { %1811 = vmatprep.mubr.msk.f32.mxu1 %vm361_vm0, %v1673_v19  ;;  %1817 = vmatprep.subr.mxu0 %v2099_v0  ;;  %v1482_v45 = vadd.f32 %v1481_v44, %v1479_v43 }
  0x26   : > { %1827 = vmatprep.subr.mxu1 %v2099_v0  ;;  %1802 = vmatmul.mubr.msk.f32.vlgmr.msra.gmra.mxu0 %vm361_vm0, %v926_v20 }
  0x27   : > { %1812 = vmatmul.mubr.msk.f32.vlgmr.msra.gmra.mxu1 %vm361_vm0, %v1674_v21  ;;  %1818 = vmatpush3.msra.mxu0 %v2099_v0 }
  0x28   : > { %1828 = vmatpush3.msra.mxu1 %v2099_v0  ;;  %1804 = vmatprep.mubr.msk.f32.mxu0 %vm361_vm0, %v927_v22 }
  0x29   : > { %1814 = vmatprep.mubr.msk.f32.mxu1 %vm361_vm0, %v1675_v23  ;;  %1819 = vmatprep.subr.mxu0 %v2104_v1 }
  0x2a   : > { %1829 = vmatprep.subr.mxu1 %v2104_v1  ;;  %1805 = vmatmul.mubr.msk.f32.gmra.mxu0 %vm361_vm0, %v928_v24 }
  0x2b   : > { %1815 = vmatmul.mubr.msk.f32.gmra.mxu1 %vm361_vm0, %v1676_v25  ;;  %1820 = vmatpush3.msra.mxu0 %v2104_v1 }
  0x2c   : > { %1830 = vmatpush3.msra.mxu1 %v2104_v1  ;;  %1821 = vmatprep.mubr.msk.f32.mxu0 %vm361_vm0, %v1681_v26 }
  0x2d   : > { %1831 = vmatprep.mubr.msk.f32.mxu1 %vm361_vm0, %v1689_v27  ;;  %1483 = vadd.xlane.f32.xlu1 %v1482_v45 }
  0x2e   : > { %1822 = vmatmul.mubr.msk.f32.vlgmr.msra.gmra.mxu0 %vm361_vm0, %v1682_v28 }
  0x2f   : > { %1832 = vmatmul.mubr.msk.f32.vlgmr.msra.gmra.mxu1 %vm361_vm0, %v1690_v29  ;;  %1824 = vmatprep.mubr.msk.f32.mxu0 %vm361_vm0, %v1683_v30 }
  0x30   : > { %1834 = vmatprep.mubr.msk.f32.mxu1 %vm361_vm0, %v1691_v31 }
  0x32   : > { %1825 = vmatmul.mubr.msk.f32.gmra.mxu0 %vm361_vm0, %v1684_v32 }
  0x33   : > { %1835 = vmatmul.mubr.msk.f32.gmra.mxu1 %vm361_vm0, %v1692_v33  ;;  %vm877_vm0 = vcmp.eq.s32.totalorder %v2227_v35, 3 }
  0xd6   : > { %v2245_v46 = vpop.f32.mrf.mxu0 }
  0xd7   : > { %v2247_v47 = vpop.f32.mrf.mxu1 }
  0xd8   : > { %v2249_v48 = vpop.f32.mrf.mxu0  ;;  %v766_v54 = vmax.f32 %v2245_v46, %v2247_v47 }
  0xd9   : > { %v2251_v49 = vpop.f32.mrf.mxu1 }
  0xda   : > { %v2253_v50 = vpop.f32.mrf.mxu0  ;;  %v765_v57 = vmax.f32 %v2249_v48, %v2251_v49 }
  0xdb   : > { %v2255_v51 = vpop.f32.mrf.mxu1 }
  0xdc   : > { %v2257_v52 = vpop.f32.mrf.mxu0  ;;  %v768_v63 = vmax.f32 %v2253_v50, %v2255_v51 }
  0xdd   : > { %v2259_v53 = vpop.f32.mrf.mxu1 }
  0xde   : > { %v2263_v55 = vpop.f32.mrf.mxu0  ;;  %v767_v25 = vmax.f32 %v2257_v52, %v2259_v53 }
  0xdf   : > { %v2265_v56 = vpop.f32.mrf.mxu1  ;;  %v770_v58 = vmax.f32 %v766_v54, %v2263_v55 }
  0xe0   : > { %v2270_v59 = vpop.f32.mrf.mxu0 }
  0xe1   : > { %v2272_v60 = vpop.f32.mrf.mxu1  ;;  %v2275_v61 = vmax.f32 %v770_v58, %v2265_v56  ;;  %v769_v62 = vmax.f32 %v765_v57, %v2270_v59 }
  0xe2   : > { %v2280_v0 = vpop.f32.mrf.mxu0 }
  0xe3   : > { %v2282_v1 = vpop.f32.mrf.mxu1  ;;  %v778_v2 = vsub.f32 %v2245_v46, %v2275_v61  ;;  %v806_v3 = vsub.f32 %v2247_v47, %v2275_v61  ;;  %v834_v4 = vsub.f32 %v2263_v55, %v2275_v61  ;;  %v862_v5 = vsub.f32 %v2265_v56, %v2275_v61 }
  0xe4   : > { %v2293_v6 = vmax.f32 %v769_v62, %v2272_v60  ;;  %v772_v7 = vmax.f32 %v768_v63, %v2280_v0  ;;  %v2296_v8 = vpop.f32.mrf.mxu0 }
  0xe5   : > { %v2298_v9 = vpop.f32.mrf.mxu1  ;;  %v783_v10 = vmul.f32 1.442695, %v778_v2  ;;  %v811_v11 = vmul.f32 1.442695, %v806_v3  ;;  %v839_v12 = vmul.f32 1.442695, %v834_v4  ;;  %v771_v31 = vmax.f32 %v767_v25, %v2296_v8 }
  0xe6   : > { %v867_v13 = vmul.f32 1.442695, %v862_v5  ;;  %v777_v14 = vsub.f32 %v2249_v48, %v2293_v6  ;;  %v805_v15 = vsub.f32 %v2251_v49, %v2293_v6  ;;  %v833_v16 = vsub.f32 %v2270_v59, %v2293_v6  ;;  %v2306_v17 = vpop.f32.mrf.mxu0 }
  0xe7   : > { %v2308_v18 = vpop.f32.mrf.mxu1  ;;  %1893 = vpow2.f32 %v783_v10  ;;  %v2311_v19 = vmax.f32 %v772_v7, %v2282_v1  ;;  %v861_v22 = vsub.f32 %v2272_v60, %v2293_v6  ;;  %v2337_v41 = vmax.f32 %v771_v31, %v2298_v9 }
  0xe8   : > { %1895 = vpow2.f32 %v811_v11  ;;  %v781_v20 = vmul.f32 1.442695, %v777_v14  ;;  %v809_v21 = vmul.f32 1.442695, %v805_v15  ;;  %v2315_v23 = vpop.f32.mrf.mxu0  ;;  %v837_v27 = vmul.f32 1.442695, %v833_v16 }
  0xe9   : > { %v2317_v24 = vpop.f32.mrf.mxu1  ;;  %1897 = vpow2.f32 %v839_v12  ;;  %v780_v26 = vsub.f32 %v2253_v50, %v2311_v19  ;;  %v808_v28 = vsub.f32 %v2255_v51, %v2311_v19  ;;  %v836_v30 = vsub.f32 %v2280_v0, %v2311_v19 }
  0xea   : > { %1899 = vpow2.f32 %v867_v13  ;;  %v2325_v29 = vpop.f32.mrf.mxu0  ;;  %v865_v32 = vmul.f32 1.442695, %v861_v22  ;;  %v864_v33 = vsub.f32 %v2282_v1, %v2311_v19  ;;  %v779_v44 = vsub.f32 %v2257_v52, %v2337_v41 }
  0xeb   : > { %1901 = vpow2.f32 %v781_v20  ;;  %v2332_v38 = vpop.f32.mrf.mxu1  ;;  %v787_v40 = vmul.f32 1.442695, %v780_v26  ;;  %v815_v42 = vmul.f32 1.442695, %v808_v28  ;;  %v843_v43 = vmul.f32 1.442695, %v836_v30 }
  0xec   : > { %1903 = vpow2.f32 %v809_v21  ;;  %v2334_v39 = vpop.f32.mrf.mxu0  ;;  %v807_v45 = vsub.f32 %v2259_v53, %v2337_v41  ;;  %v835_v54 = vsub.f32 %v2296_v8, %v2337_v41  ;;  %v871_v57 = vmul.f32 1.442695, %v864_v33 }
  0xed   : > { %1905 = vpow2.f32 %v837_v27  ;;  %v2345_v58 = vpop.f32.mrf.mxu1  ;;  %v785_v63 = vmul.f32 1.442695, %v779_v44  ;;  %v863_v2 = vsub.f32 %v2298_v9, %v2337_v41  ;;  %v1333_v4 = vmax.f32 %v2306_v17, %v2308_v18 }
  0xee   : > { %1907 = vpow2.f32 %v865_v32  ;;  %v2347_v62 = vpop.f32.mrf.mxu0  ;;  %v813_v3 = vmul.f32 1.442695, %v807_v45  ;;  %v841_v5 = vmul.f32 1.442695, %v835_v54  ;;  %v1332_v15 = vmax.f32 %v2315_v23, %v2317_v24 }
  0xef   : > { %1909 = vpow2.f32 %v787_v40  ;;  %v1337_v10 = vmax.f32 %v1333_v4, %v2347_v62  ;;  %v2354_v11 = vpop.f32.mrf.mxu1  ;;  %v869_v14 = vmul.f32 1.442695, %v863_v2 }
  0xf0   : > { %1911 = vpow2.f32 %v815_v42  ;;  %v2356_v12 = vpop.f32.mrf.mxu0  ;;  %v1335_v42 = vmax.f32 %v2325_v29, %v2332_v38 }
  0xf1   : > { %1913 = vpow2.f32 %v843_v43  ;;  %v2361_v21 = vmax.f32 %v1337_v10, %v2354_v11  ;;  %v1336_v25 = vmax.f32 %v1332_v15, %v2356_v12  ;;  %v2370_v32 = vpop.f32.mrf.mxu1 }
  0xf2   : > { %1915 = vpow2.f32 %v871_v57  ;;  %2614 = vst [vmem:[#allocation10_spill] sm:$0xff] %v2370_v32  ;;  %v2372_v33 = vpop.f32.mrf.mxu0 }
  0xf3   : > { %1917 = vpow2.f32 %v785_v63  ;;  %2613 = vst [vmem:[#allocation9_spill] sm:$0xff] %v2361_v21  ;;  %v1345_v28 = vsub.f32 %v2306_v17, %v2361_v21  ;;  %v1369_v30 = vsub.f32 %v2308_v18, %v2361_v21  ;;  %v1393_v31 = vsub.f32 %v2347_v62, %v2361_v21  ;;  %2615 = vst [vmem:[#allocation11_spill] sm:$0xff] %v2372_v33 }
  0xf4   : > { %v1894_v7 = vpop.eup %1893  ;;  %1919 = vpow2.f32 %v813_v3  ;;  %v1417_v43 = vsub.f32 %v2354_v11, %v2361_v21  ;;  %v2379_v44 = vmax.f32 %v1336_v25, %v2370_v32 }
  0xf5   : > { %v1896_v13 = vpop.eup %1895  ;;  %1921 = vpow2.f32 %v841_v5  ;;  %v1350_v57 = vmul.f32 1.442695, %v1345_v28  ;;  %v1374_v63 = vmul.f32 1.442695, %v1369_v30  ;;  %v1398_v3 = vmul.f32 1.442695, %v1393_v31  ;;  %v2394_v28 = vpop.f32.mrf.mxu1 }
  0xf6   : > { %v1898_v16 = vpop.eup %1897  ;;  %v818_v20 = vadd.f32 %v1896_v13, %v1894_v7  ;;  %1923 = vpow2.f32 %v869_v14  ;;  %v1344_v4 = vsub.f32 %v2315_v23, %v2379_v44  ;;  %v1368_v5 = vsub.f32 %v2317_v24, %v2379_v44  ;;  %2617 = vst [vmem:[#allocation13_spill] sm:$0xff] %v2394_v28 }
  0xf7   : > { %v1900_v22 = vpop.eup %1899  ;;  %v1339_v7 = vmax.f32 %v1335_v42, %v2372_v33  ;;  %v1392_v13 = vsub.f32 %v2356_v12, %v2379_v44  ;;  %v1416_v14 = vsub.f32 %v2370_v32, %v2379_v44 }
  0xf8   : > { %v1902_v26 = vpop.eup %1901  ;;  %v846_v27 = vadd.f32 %v1898_v16, %v818_v20  ;;  %v1422_v16 = vmul.f32 1.442695, %v1417_v43  ;;  %v2390_v20 = vpop.f32.mrf.mxu0  ;;  %v1372_v31 = vmul.f32 1.442695, %v1368_v5 }
  0xf9   : > { %v1904_v40 = vpop.eup %1903  ;;  %2616 = vst [vmem:[#allocation12_spill] sm:$0xff] %v2390_v20  ;;  %v1396_v43 = vmul.f32 1.442695, %v1392_v13 }
  0xfa   : > { %v874_v45 = vadd.f32 %v1900_v22, %v846_v27  ;;  %v817_v54 = vadd.f32 %v1904_v40, %v1902_v26  ;;  %v1906_v2 = vpop.eup %1905  ;;  %v1334_v26 = vmax.f32 %v2334_v39, %v2345_v58  ;;  %v1348_v27 = vmul.f32 1.442695, %v1344_v4 }
  0xfb   : > { %v1908_v15 = vpop.eup %1907  ;;  %v2397_v40 = vmax.f32 %v1339_v7, %v2394_v28 }
  0xfc   : > { %1925 = vlog2.f32 %v874_v45  ;;  %v845_v10 = vadd.f32 %v1906_v2, %v817_v54  ;;  %v1910_v22 = vpop.eup %1909  ;;  %v1420_v45 = vmul.f32 1.442695, %v1416_v14  ;;  %v1338_v54 = vmax.f32 %v1334_v26, %v2390_v20 }
  0xfd   : > { %1927 = vpow2.f32 %v1350_v57  ;;  %v1912_v30 = vpop.eup %1911  ;;  %2618 = vst [vmem:[#allocation14_spill] sm:$0xff] %v2397_v40  ;;  %v1371_v2 = vsub.f32 %v2332_v38, %v2397_v40  ;;  %v1419_v5 = vsub.f32 %v2394_v28, %v2397_v40 }
  0xfe   : > { %v873_v25 = vadd.f32 %v1908_v15, %v845_v10  ;;  %1929 = vpow2.f32 %v1374_v63  ;;  %v1914_v42 = vpop.eup %1913  ;;  %v1347_v63 = vsub.f32 %v2325_v29, %v2397_v40  ;;  %v2408_v15 = vpop.f32.mrf.mxu1 }
  0xff   : > { %1931 = vpow2.f32 %v1398_v3  ;;  %v1916_v57 = vpop.eup %1915  ;;  %v1395_v3 = vsub.f32 %v2372_v33, %v2397_v40  ;;  %v1378_v13 = vmul.f32 1.442695, %v1371_v2  ;;  %v1426_v21 = vmul.f32 1.442695, %v1419_v5 }
 0x100   : > { %1933 = vlog2.f32 %v873_v25  ;;  %v1918_v4 = vpop.eup %1917  ;;  %v1354_v10 = vmul.f32 1.442695, %v1347_v63  ;;  %v2411_v25 = vmax.f32 %v1338_v54, %v2408_v15  ;;  %v820_v33 = vadd.f32 %v1912_v30, %v1910_v22 }
 0x101   : > { %1935 = vpow2.f32 %v1422_v16  ;;  %v1920_v7 = vpop.eup %1919  ;;  %v1402_v16 = vmul.f32 1.442695, %v1395_v3 }
 0x102   : > { %1937 = vpow2.f32 %v1348_v27  ;;  %v1922_v14 = vpop.eup %1921  ;;  %v819_v27 = vadd.f32 %v1920_v7, %v1918_v4  ;;  %v1370_v63 = vsub.f32 %v2345_v58, %v2411_v25  ;;  %v848_v7 = vadd.f32 %v1914_v42, %v820_v33 }
 0x103   : > { %1939 = vpow2.f32 %v1372_v31  ;;  %v1924_v26 = vpop.eup %1923  ;;  %v1346_v31 = vsub.f32 %v2334_v39, %v2411_v25 }
 0x104   : > { %1941 = vpow2.f32 %v1396_v43  ;;  %v1394_v43 = vsub.f32 %v2390_v20, %v2411_v25  ;;  %v847_v54 = vadd.f32 %v1922_v14, %v819_v27  ;;  %v1376_v5 = vmul.f32 1.442695, %v1370_v63 }
 0x105   : > { %1943 = vpow2.f32 %v1420_v45  ;;  %v1418_v45 = vsub.f32 %v2408_v15, %v2411_v25  ;;  %v1352_v3 = vmul.f32 1.442695, %v1346_v31  ;;  %v876_v20 = vadd.f32 %v1916_v57, %v848_v7 }
 0x106   : > { %1945 = vpow2.f32 %v1354_v10  ;;  %v1400_v4 = vmul.f32 1.442695, %v1394_v43  ;;  %v797_v57 = vsel %vm793_vm6, %v2249_v48, 0.0  ;;  %v800_v7 = vsel %vm796_vm9, %v2253_v50, 0.0 }
 0x107   : > { %1947 = vpow2.f32 %v1378_v13  ;;  %v1424_v30 = vmul.f32 1.442695, %v1418_v45  ;;  %v875_v13 = vadd.f32 %v1924_v26, %v847_v54  ;;  %v826_v26 = vsel %vm822_vm8, %v2247_v47, 0.0 }
 0x108   : > { %1949 = vpow2.f32 %v1402_v16  ;;  %v825_v16 = vsel %vm821_vm7, %v2251_v49, 0.0  ;;  %v853_v49 = vsel %vm849_vm12, %v2270_v59, 0.0  ;;  %v799_v54 = vsel %vm2610_vm11, %v2257_v52, 0.0 }
 0x109   : > { %v1926_v2 = vpop.eup %1925  ;;  %1951 = vpow2.f32 %v1426_v21  ;;  %v829_v63 = vadd.f32 %v825_v16, %v797_v57  ;;  %v854_v59 = vsel %vm850_vm14, %v2263_v55, 0.0  ;;  %v828_v52 = vsel %vm824_vm10, %v2255_v51, 0.0 }
 0x10a   : > { %v1928_v22 = vpop.eup %1927  ;;  %1953 = vpow2.f32 %v1352_v3  ;;  %v827_v3 = vsel %vm2612_vm13, %v2259_v53, 0.0  ;;  %vm852_vm11 = vcmp.eq.s32.totalorder %v2234_v37, 2  ;;  %v881_v50 = vsel %vm877_vm0, %v2272_v60, 0.0 }
 0x10b   : > { %v1930_v10 = vpop.eup %1929  ;;  %1955 = vpow2.f32 %v1376_v5  ;;  %v892_v5 = vmul.f32 0.6931472, %v1926_v2  ;;  %v855_v51 = vsel %vm851_vm4, %v2296_v8, 0.0  ;;  %v856_v57 = vsel %vm852_vm11, %v2280_v0, 0.0 }
 0x10c   : > { %v1932_v40 = vpop.eup %1931  ;;  %v1381_v28 = vadd.f32 %v1930_v10, %v1928_v22  ;;  %1957 = vpow2.f32 %v1400_v4  ;;  %v857_v4 = vadd.f32 %v853_v49, %v829_v63  ;;  %vm879_vm13 = vcmp.eq.s32.totalorder %v2229_v36, 3 }
 0x10d   : > { %v1934_v32 = vpop.eup %1933  ;;  %1959 = vpow2.f32 %v1424_v30 }
 0x10e   : > { %v1936_v14 = vpop.eup %1935  ;;  %v1405_v21 = vadd.f32 %v1932_v40, %v1381_v28  ;;  %1961 = vlog2.f32 %v875_v13  ;;  %v798_v40 = vsel %vm794_vm5, %v2245_v46, 0.0  ;;  %v890_v46 = vmul.f32 0.6931472, %v1934_v32 }
 0x10f   : > { %v1938_v33 = vpop.eup %1937  ;;  %1963 = vlog2.f32 %v876_v20  ;;  %v830_v45 = vadd.f32 %v826_v26, %v798_v40  ;;  %v832_v40 = vadd.f32 %v828_v52, %v800_v7  ;;  %v1361_v7 = vsel %vm794_vm5, %v2306_v17, 0.0 }
 0x110   : > { %v1940_v42 = vpop.eup %1939  ;;  %v1429_v20 = vadd.f32 %v1936_v14, %v1405_v21  ;;  %v897_v55 = vadd.f32 %v890_v46, %v2293_v6  ;;  %v831_v14 = vadd.f32 %v827_v3, %v799_v54  ;;  %v882_v21 = vsel %vm2611_vm15, %v2265_v56, 0.0 }
 0x111   : > { %v1942_v28 = vpop.eup %1941  ;;  %v1380_v27 = vadd.f32 %v1940_v42, %v1938_v33  ;;  %v858_v10 = vadd.f32 %v854_v59, %v830_v45  ;;  %v898_v42 = vadd.f32 %v892_v5, %v2275_v61  ;;  %v885_v6 = vadd.f32 %v881_v50, %v857_v4 }
 0x112   : > { %v1944_v48 = vpop.eup %1943  ;;  %1965 = vlog2.f32 %v1429_v20  ;;  %vm880_vm15 = vcmp.eq.s32.totalorder %v2234_v37, 3  ;;  %v859_v8 = vadd.f32 %v855_v51, %v831_v14  ;;  %v860_v61 = vadd.f32 %v856_v57, %v832_v40  ;;  %v2623_v57 = vld [vmem:[#allocation10_spill] sm:$0xff]  ;;  %v2625_v40 = vld [vmem:[#allocation12_spill] sm:$0xff] }
 0x113   : > { %v1946_v31 = vpop.eup %1945  ;;  %v1404_v43 = vadd.f32 %v1942_v28, %v1380_v27  ;;  %v886_v26 = vadd.f32 %v882_v21, %v858_v10  ;;  %v901_v27 = vsub.f32 %v897_v55, %v885_v6  ;;  %v884_v0 = vsel %vm880_vm15, %v2282_v1, 0.0 }
 0x114   : > { %v1948_v47 = vpop.eup %1947  ;;  %v883_v46 = vsel %vm879_vm13, %v2298_v9, 0.0  ;;  %v888_v59 = vadd.f32 %v884_v0, %v860_v61  ;;  %v1360_v1 = vsel %vm793_vm6, %v2315_v23, 0.0  ;;  %v1384_v9 = vsel %vm821_vm7, %v2317_v24, 0.0 }
 0x115   : > { %v1428_v32 = vadd.f32 %v1944_v48, %v1404_v43  ;;  %v1383_v22 = vadd.f32 %v1948_v47, %v1946_v31  ;;  %v1950_v30 = vpop.eup %1949  ;;  %v902_v31 = vsub.f32 %v898_v42, %v886_v26  ;;  %v887_v45 = vadd.f32 %v883_v46, %v859_v8  ;;  %v2628_v46 = vld [vmem:[#allocation14_spill] sm:$0xff] }
 0x116   : > { %v1952_v53 = vpop.eup %1951  ;;  %v905_v3 = vsel %vm352_vm1, %v901_v27, 0.0  ;;  %v1408_v23 = vsel %vm849_vm12, %v2356_v12, 0.0  ;;  %v1363_v10 = vsel %vm796_vm9, %v2325_v29, 0.0  ;;  %v1387_v17 = vsel %vm824_vm10, %v2332_v38, 0.0 }
 0x117   : > { %1967 = vlog2.f32 %v1428_v32  ;;  %v1407_v2 = vadd.f32 %v1950_v30, %v1383_v22  ;;  %v1954_v13 = vpop.eup %1953  ;;  %v906_v32 = vsel %vm353_vm2, %v902_v31, 0.0  ;;  %vm2619_vm5 = vcmp.ne.s32.totalorder %v2234_v37, 4294967295 }
 0x118   : > { %v1956_v33 = vpop.eup %1955  ;;  %v909_v22 = vadd.f32 %v906_v32, %v905_v3  ;;  %vm2620_vm6 = vcmp.eq.s32.totalorder %v2229_v36, 0  ;;  %vm2621_vm7 = vcmp.eq.s32.totalorder %v2229_v36, 1 }
 0x119   : > { %v1431_v16 = vadd.f32 %v1952_v53, %v1407_v2  ;;  %v1958_v28 = vpop.eup %1957  ;;  %v1382_v56 = vadd.f32 %v1956_v33, %v1954_v13  ;;  %v1388_v53 = vadd.f32 %v1384_v9, %v1360_v1  ;;  %v1362_v29 = vsel %vm2620_vm6, %v2334_v39, 0.0 }
 0x11a   : > { %v1960_v60 = vpop.eup %1959  ;;  %v1386_v38 = vsel %vm2621_vm7, %v2345_v58, 0.0  ;;  %v1391_v33 = vadd.f32 %v1387_v17, %v1363_v10  ;;  %v1410_v58 = vsel %vm851_vm4, %v2625_v40, 0.0  ;;  %vm2629_vm4 = vmmov %vm2619_vm5 }
 0x11b   : > { %1969 = vlog2.f32 %v1431_v16  ;;  %v1962_v48 = vpop.eup %1961  ;;  %v1406_v49 = vadd.f32 %v1958_v28, %v1382_v56  ;;  %v1412_v21 = vadd.f32 %v1408_v23, %v1388_v53  ;;  %v1432_v16 = vsel %vm877_vm0, %v2623_v57, 0.0  ;;  %v2624_v28 = vld [vmem:[#allocation11_spill] sm:$0xff] }
 0x11c   : > { %v1964_v20 = vpop.eup %1963  ;;  %v894_v63 = vmul.f32 0.6931472, %v1962_v48  ;;  %v1411_v39 = vsel %vm852_vm11, %v2624_v28, 0.0  ;;  %v1390_v56 = vadd.f32 %v1386_v38, %v1362_v29 }
 0x11d   : > { %v1430_v43 = vadd.f32 %v1960_v60, %v1406_v49  ;;  %v896_v47 = vmul.f32 0.6931472, %v1964_v20  ;;  %v2626_v60 = vld [vmem:[#allocation9_spill] sm:$0xff]  ;;  %v1436_v26 = vadd.f32 %v1432_v16, %v1412_v21 }
 0x11e   : > { %v899_v54 = vadd.f32 %v894_v63, %v2337_v41  ;;  %v1414_v61 = vadd.f32 %v1410_v58, %v1390_v56  ;;  %v2627_v20 = vld [vmem:[#allocation13_spill] sm:$0xff] }
 0x11f   : > { %1971 = vlog2.f32 %v1430_v43  ;;  %v900_v5 = vadd.f32 %v896_v47, %v2311_v19  ;;  %v1966_v30 = vpop.eup %1965  ;;  %v1385_v19 = vsel %vm822_vm8, %v2308_v18, 0.0  ;;  %v1409_v18 = vsel %vm850_vm14, %v2347_v62, 0.0 }
 0x120   : > { %v903_v4 = vsub.f32 %v899_v54, %v887_v45  ;;  %v1389_v13 = vadd.f32 %v1385_v19, %v1361_v7  ;;  %v1443_v14 = vmul.f32 0.6931472, %v1966_v30  ;;  %vm2622_vm8 = vcmp.eq.s32.totalorder %v2225_v34, 3  ;;  %v1484_v7 = vpop.xlane.xlu1 %1483 }
 0x121   : > { %v904_v41 = vsub.f32 %v900_v5, %v888_v59  ;;  %v1433_v6 = vsel %vm2622_vm8, %v2354_v11, 0.0  ;;  %v1415_v11 = vadd.f32 %v1411_v39, %v1391_v33  ;;  %v1435_v31 = vsel %vm880_vm15, %v2627_v20, 0.0 }
 0x122   : > { %v907_v24 = vsel %vm354_vm3, %v903_v4, 0.0  ;;  %v1413_v42 = vadd.f32 %v1409_v18, %v1389_v13  ;;  %v1434_v47 = vsel %vm879_vm13, %v2408_v15, 0.0  ;;  %v1485_v23 = vrot.slane %v1484_v7, 4 }
 0x123   : > { %v910_v55 = vadd.f32 %v909_v22, %v907_v24  ;;  %v908_v12 = vsel %vm2619_vm5, %v904_v41, 0.0  ;;  %v1439_v45 = vadd.f32 %v1435_v31, %v1415_v11  ;;  %v1438_v54 = vadd.f32 %v1434_v47, %v1414_v61 }
 0x124   : > { %v1968_v52 = vpop.eup %1967  ;;  %v1437_v8 = vadd.f32 %v1433_v6, %v1413_v42 }
 0x125   : > { %v1441_v2 = vmul.f32 0.6931472, %v1968_v52  ;;  %v911_v50 = vadd.f32 %v910_v55, %v908_v12  ;;  %v1486_v52 = vadd.f32 %v1485_v23, %v1484_v7 }
 0x127   : > { %v1448_v62 = vadd.f32 %v1441_v2, %v2379_v44  ;;  %912 = vadd.xlane.f32.xlu0 %v911_v50  ;;  %v1449_v44 = vadd.f32 %v1443_v14, %v2626_v60  ;;  %v1487_v37 = vrot.slane %v1486_v52, 2 }
 0x128   : > { %v1970_v51 = vpop.eup %1969 }
 0x129   : > { %v1447_v27 = vmul.f32 0.6931472, %v1970_v51  ;;  %v1452_v48 = vsub.f32 %v1448_v62, %v1436_v26  ;;  %v1453_v0 = vsub.f32 %v1449_v44, %v1437_v8  ;;  %v1488_v17 = vadd.f32 %v1487_v37, %v1486_v52 }
 0x12b   : > { %v1451_v43 = vadd.f32 %v1447_v27, %v2628_v46  ;;  %v1456_v59 = vsel %vm352_vm1, %v1452_v48, 0.0  ;;  %v1457_v9 = vsel %vm353_vm2, %v1453_v0, 0.0  ;;  %v1489_v12 = vrot.slane %v1488_v17, 1 }
 0x12c   : > { %v1972_v49 = vpop.eup %1971  ;;  %v1460_v4 = vadd.f32 %v1457_v9, %v1456_v59 }
 0x12d   : > { %v1445_v63 = vmul.f32 0.6931472, %v1972_v49  ;;  %v1455_v1 = vsub.f32 %v1451_v43, %v1439_v45  ;;  %v1490_v21 = vadd.f32 %v1489_v12, %v1488_v17 }
 0x12f   : > { %v1450_v3 = vadd.f32 %v1445_v63, %v2411_v25  ;;  %v1459_v15 = vsel %vm2629_vm4, %v1455_v1, 0.0 }
 0x131   : > { %v1454_v5 = vsub.f32 %v1450_v3, %v1438_v54 }
 0x133   : > { %v1458_v32 = vsel %vm354_vm3, %v1454_v5, 0.0 }
 0x134   : > { %v1461_v41 = vadd.f32 %v1460_v4, %v1458_v32 }
 0x136   : > { %v1462_v22 = vadd.f32 %v1461_v41, %v1459_v15 }
 0x138   : > { %1463 = vadd.xlane.f32.xlu0 %v1462_v22 }
 0x1b0   : > { %v913_v35 = vpop.xlane.xlu0 %912 }
 0x1b1   : > { %v914_v25 = vrot.slane %v913_v35, 4 }
 0x1b3   : > { %v915_v30 = vadd.f32 %v914_v25, %v913_v35 }
 0x1b5   : > { %v916_v34 = vrot.slane %v915_v30, 2 }
 0x1b7   : > { %v917_v19 = vadd.f32 %v916_v34, %v915_v30 }
 0x1b9   : > { %v918_v36 = vrot.slane %v917_v19, 1 }
 0x1bb   : > { %v919_v24 = vadd.f32 %v918_v36, %v917_v19 }
 0x1bd   : > { %1837 = vpush %v919_v24 }
 0x1c1   : > { %v1464_v53 = vpop.xlane.xlu0 %1463 }
 0x1c2   : > { %v1465_v10 = vrot.slane %v1464_v53, 4 }
 0x1c4   : > { %v1466_v55 = vadd.f32 %v1465_v10, %v1464_v53 }
 0x1c6   : > { %v1467_v18 = vrot.slane %v1466_v55, 2 }
 0x1c8   : > { %v1468_v2 = vadd.f32 %v1467_v18, %v1466_v55 }
 0x1ca   : > { %v1469_v13 = vrot.slane %v1468_v2, 1 }
 0x1cc   : > { %v1470_v14 = vadd.f32 %v1469_v13, %v1468_v2 }
 0x1ce   : > { %1839 = vpush %v1470_v14 }
 0x1cf   : > { %1841 = vpush %v1490_v21 }
 0x1ee   : > { %s1838_s20 = spop %1837 }
 0x1ef   : > { %s921_s26 = sadd.f32 %s1838_s20, %s356_s19 }
 0x1f1   : > { %923 = sst [smem:[#allocation2]] %s921_s26 }
 0x1f2   : > { %1847 = dma.smem_to_hbm (%p2560_p6), %s2037_s27, 16, %s2600_s4, [#allocation3]  }
 0x1ff   : > { %s1840_s8 = spop %1839 }
 0x200   : > { %s1472_s9 = sadd.f32 %s1840_s8, %s924_s30  ;;  %s1842_s24 = spop %1841 }
 0x201   : > { %s1492_s10 = sadd.f32 %s1842_s24, %s1475_s7 }
 0x202   : > { %1474 = sst [smem:[#allocation4]] %s1472_s9 }
 0x203   : > { %1849 = dma.smem_to_hbm (%p2560_p6), %s2038_s11, 16, %s2601_s5, [#allocation5]  }
 0x204   : > { %1494 = sst [smem:[#allocation6]] %s1492_s10 }
 0x205   : > { %1851 = dma.smem_to_hbm (%p2560_p6), %s2039_s14, 16, %s2602_s6, [#allocation5]  }
 0x206   : > { %2016 = dma.done.wait (%p2560_p6), [#allocation3], 16  }
 0x207   : > { %2018 = vsyncadd (%p2560_p6), [#allocation3], 4294967280 }
 0x208   : > { %2020 = dma.done.wait (%p2560_p6), [#allocation5], 32  }
 0x209   : > { %2022 = vsyncadd (%p2560_p6), [#allocation5], 4294967264 }
 0x20a   : > { %1534 = sfence }
 0x20b PF: > { %s19_s23 = sadd.s32 1, %s2033_s23   ;;  %s2631_s21 = smov %s2029_s22 }
 0x20c   : > { %p16_p7 = scmp.ge.s32.totalorder %s19_s23, 4   ;;  %s2632_s22 = smov %s2634_s25 }
 0x20e   :  { %18 = sbr.rel (!%p16_p7) target bundleno = 3 (0x3), region = 101 }
 0x213   :  { %1540 = vsyncpa [#allocation3], 1 }
 0x214   :  { %1542 = vsyncpa [#allocation3 + $0x1], 1 }
 0x215   :  { %1543 = vsyncpa [#allocation5], 1 }

</bundles_post_ra>
